<compile_context>
chip_gen: v7x
topology: tpu7x:2x2x1
jax: 0.10.0
libtpu: 0.0.40
codegen_flags: <defaults>
</compile_context>

<pallas_src>
import functools

import jax
import jax.numpy as jnp
from jax.experimental import pallas as pl
from jax.experimental.pallas import tpu as pltpu

INPUT_SIZE = 4
HIDDEN_SIZE = 64
OUTPUT_SIZE = 2


def _cdiv(a, b):
    return -(-a // b)


def _round_up(n, m):
    return ((n + m - 1) // m) * m


def _block_diag(w, p):
    """(fi, fo) -> (p*fi, p*fo) with `w` repeated on the diagonal blocks."""
    return jnp.kron(jnp.eye(p, dtype=w.dtype), w)


def _qnet_kernel(x_ref, w1_ref, b1_ref, w2_ref, b2_ref, w3_ref, b3_ref, o_ref):
    """Fused 3-layer MLP on one (tm, P*in) tile of lane-packed samples.

    Layer 1 (tiny K) runs on the VPU as rank-1 broadcast FMAs (f32); layers 2/3 run on the
    MXU with bf16 operands and f32 accumulation; bias-add / ReLU stay f32 on the VPU.
    """
    x = x_ref[...]                  # (tm, P*in) f32
    k_dim = w1_ref.shape[0]         # P*in (e.g. 16)

    # ---- layer 1 on the VPU: h1 = x @ W1_blockdiag + b1 via K rank-1 updates ----
    h1 = x[:, 0:1] * w1_ref[0:1, :]
    for k in range(1, k_dim):
        h1 = h1 + x[:, k:k + 1] * w1_ref[k:k + 1, :]
    h1 = jnp.maximum(h1 + b1_ref[...], 0.0)

    # ---- layers 2 & 3 on the MXU (bf16 in, f32 accumulate) ----
    h2 = jnp.dot(h1.astype(jnp.bfloat16), w2_ref[...],
                 preferred_element_type=jnp.float32) + b2_ref[...]
    h2 = jnp.maximum(h2, 0.0)

    out = jnp.dot(h2.astype(jnp.bfloat16), w3_ref[...],
                  preferred_element_type=jnp.float32) + b3_ref[...]
    o_ref[...] = out.astype(o_ref.dtype)


@functools.partial(jax.jit, static_argnames=("block_rows", "pack", "core_parallel"))
def qnetwork_forward(x, w1, b1, w2, b2, w3, b3, *,
                     block_rows=1024, pack=4, core_parallel=False):
    """Fused QNetwork forward pass.

    x : (B, input_size) float32
    w1: (input_size, hidden)   b1: (1, hidden)
    w2: (hidden, hidden)       b2: (1, hidden)
    w3: (hidden, output_size)  b3: (1, output_size)

    block_rows   : packed rows per grid step (~6-7 KiB of VMEM per packed row).
    pack         : samples packed per row; 4 fills the 256-wide MXU on v6e/v7x, use 2 on v5e.
    core_parallel: set True on v7x to shard batch tiles across both TensorCores.
    returns (B, output_size) float32
    """
    B, in_f = x.shape
    hid = w1.shape[1]
    out_f = w3.shape[1]
    P = pack

    # ---- lane-pack the batch: P samples per packed row --------------------------------
    rows = max(1, _cdiv(B, P))                    # packed rows of real data
    n_steps = max(1, _cdiv(rows, block_rows))
    tm = _round_up(_cdiv(rows, n_steps), 8)       # rows per grid step (sublane multiple)
    grid_m = _cdiv(rows, tm)
    rows_pad = grid_m * tm                        # padding waste < 8 rows per grid step
    pad = rows_pad * P - B
    if pad:
        x = jnp.pad(x, ((0, pad), (0, 0)))
    xp = x.reshape(rows_pad, P * in_f)

    # ---- block-diagonal / tiled parameters (tiny, built once per compile) -------------
    w1p = _block_diag(w1, P)                       # (P*in,  P*hid) f32  (VPU layer)
    w2p = _block_diag(w2, P).astype(jnp.bfloat16)  # (P*hid, P*hid)
    w3p = _block_diag(w3, P).astype(jnp.bfloat16)  # (P*hid, P*out)
    b1p = jnp.tile(b1, (1, P))
    b2p = jnp.tile(b2, (1, P))
    b3p = jnp.tile(b3, (1, P))

    sem = (pltpu.CORE_PARALLEL,) if core_parallel else (pltpu.PARALLEL,)

    out = pl.pallas_call(
        _qnet_kernel,
        out_shape=jax.ShapeDtypeStruct((rows_pad, P * out_f), jnp.float32),
        grid=(grid_m,),
        in_specs=[
            # x tiles march down the packed batch; parameters are pinned to block (0, 0)
            # so they stay VMEM-resident across all grid steps.
            pl.BlockSpec((tm, P * in_f), lambda i: (i, 0)),
            pl.BlockSpec((P * in_f, P * hid), lambda i: (0, 0)),
            pl.BlockSpec((1, P * hid), lambda i: (0, 0)),
            pl.BlockSpec((P * hid, P * hid), lambda i: (0, 0)),
            pl.BlockSpec((1, P * hid), lambda i: (0, 0)),
            pl.BlockSpec((P * hid, P * out_f), lambda i: (0, 0)),
            pl.BlockSpec((1, P * out_f), lambda i: (0, 0)),
        ],
        out_specs=pl.BlockSpec((tm, P * out_f), lambda i: (i, 0)),
        compiler_params=pltpu.CompilerParams(dimension_semantics=sem),
    )(xp, w1p, b1p, w2p, b2p, w3p, b3p)

    # Unpack: packed row r holds samples r*P .. r*P+P-1, each out_f lanes wide.
    return out.reshape(rows_pad * P, out_f)[:B]


def init_params(key, input_size=INPUT_SIZE, hidden=HIDDEN_SIZE,
                output_size=OUTPUT_SIZE):
    """Deterministic init mimicking PyTorch nn.Linear default (U[-1/sqrt(fan_in), +])."""
    ks = jax.random.split(key, 6)

    def linear(kw, kb, fan_in, fan_out):
        bound = 1.0 / jnp.sqrt(jnp.float32(fan_in))
        w = jax.random.uniform(kw, (fan_in, fan_out), jnp.float32, -bound, bound)
        b = jax.random.uniform(kb, (1, fan_out), jnp.float32, -bound, bound)
        return w, b

    w1, b1 = linear(ks[0], ks[1], input_size, hidden)
    w2, b2 = linear(ks[2], ks[3], hidden, hidden)
    w3, b3 = linear(ks[4], ks[5], hidden, output_size)
    return w1, b1, w2, b2, w3, b3


def _reference_f32(x, w1, b1, w2, b2, w3, b3):
    h1 = jnp.maximum(x @ w1 + b1, 0.0)
    h2 = jnp.maximum(h1 @ w2 + b2, 0.0)
    return h2 @ w3 + b3


def _reference_mixed(x, w1, b1, w2, b2, w3, b3):
    # Mirrors the kernel's arithmetic: f32 first layer, bf16-in / f32-accumulate layers 2 & 3.
    bf, f32 = jnp.bfloat16, jnp.float32
    h1 = jnp.maximum(x @ w1 + b1, 0.0)
    h2 = jnp.maximum(
        jnp.dot(h1.astype(bf), w2.astype(bf), preferred_element_type=f32) + b2, 0.0)
    return jnp.dot(h2.astype(bf), w3.astype(bf), preferred_element_type=f32) + b3


if __name__ == "__main__":
    key = jax.random.PRNGKey(0)
    k_x1, k_x2, k_p = jax.random.split(key, 3)
    params = init_params(k_p)

    # Small batch (single grid step), default pack=4.
    batch = 8
    x = jax.random.normal(k_x1, (batch, INPUT_SIZE), jnp.float32)
    out = jax.block_until_ready(qnetwork_forward(x, *params))
    assert out.shape == (batch, OUTPUT_SIZE), out.shape
    ref_m = _reference_mixed(x, *params)
    ref_f = _reference_f32(x, *params)
    assert jnp.allclose(out, ref_m, atol=2e-3, rtol=2e-3), (out, ref_m)
    assert jnp.allclose(out, ref_f, atol=5e-2, rtol=5e-2), (out, ref_f)

    # Same batch with the v5e-style packing factor.
    out_p2 = jax.block_until_ready(qnetwork_forward(x, *params, pack=2))
    assert jnp.allclose(out_p2, ref_m, atol=2e-3, rtol=2e-3), (out_p2, ref_m)

    # Larger batch not divisible by pack or tile: exercises multi-step pipelined grid,
    # pack padding and row padding.
    batch2 = 1003
    x2 = jax.random.normal(k_x2, (batch2, INPUT_SIZE), jnp.float32)
    out2 = jax.block_until_ready(qnetwork_forward(x2, *params, block_rows=64))
    assert out2.shape == (batch2, OUTPUT_SIZE), out2.shape
    ref2 = _reference_mixed(x2, *params)
    assert jnp.allclose(out2, ref2, atol=2e-3, rtol=2e-3), (out2, ref2)

    print("KERNEL_OK")
</pallas_src>

<mosaic_0001>
module attributes {stable_mosaic.version = 11 : i64} {
  func.func @_qnet_kernel(%arg0: i32, %arg1: memref<8x16xf32, #tpu.memory_space<vmem>>, %arg2: memref<16x256xf32, #tpu.memory_space<vmem>>, %arg3: memref<1x256xf32, #tpu.memory_space<vmem>>, %arg4: memref<256x256xbf16, #tpu.memory_space<vmem>>, %arg5: memref<1x256xf32, #tpu.memory_space<vmem>>, %arg6: memref<256x8xbf16, #tpu.memory_space<vmem>>, %arg7: memref<1x8xf32, #tpu.memory_space<vmem>>, %arg8: memref<8x8xf32, #tpu.memory_space<vmem>>) attributes {dimension_semantics = [#tpu.dimension_semantics<parallel>], iteration_bounds = array<i64: 1>, scalar_prefetch = 0 : i64, scratch_operands = 0 : i64, tpu.core_type = #tpu.core_type<tc>, window_params = [{transform_indices = @transform_0, window_bounds = array<i64: 8, 16>}, {pipeline_mode = #tpu.pipeline_mode<synchronous>, transform_indices = @transform_1, window_bounds = array<i64: 16, 256>}, {pipeline_mode = #tpu.pipeline_mode<synchronous>, transform_indices = @transform_2, window_bounds = array<i64: 1, 256>}, {pipeline_mode = #tpu.pipeline_mode<synchronous>, transform_indices = @transform_3, window_bounds = array<i64: 256, 256>}, {pipeline_mode = #tpu.pipeline_mode<synchronous>, transform_indices = @transform_4, window_bounds = array<i64: 1, 256>}, {pipeline_mode = #tpu.pipeline_mode<synchronous>, transform_indices = @transform_5, window_bounds = array<i64: 256, 8>}, {pipeline_mode = #tpu.pipeline_mode<synchronous>, transform_indices = @transform_6, window_bounds = array<i64: 1, 8>}, {transform_indices = @transform_7, window_bounds = array<i64: 8, 8>}]} {
    %c0 = arith.constant 0 : index
    %c0_0 = arith.constant 0 : index
    %0 = vector.load %arg1[%c0, %c0_0] : memref<8x16xf32, #tpu.memory_space<vmem>>, vector<8x16xf32>
    %1 = vector.extract_strided_slice %0 {offsets = [0, 0], sizes = [8, 1], strides = [1, 1]} : vector<8x16xf32> to vector<8x1xf32>
    %c0_1 = arith.constant 0 : index
    %c0_2 = arith.constant 0 : index
    %2 = vector.load %arg2[%c0_1, %c0_2] : memref<16x256xf32, #tpu.memory_space<vmem>>, vector<1x256xf32>
    %3 = vector.broadcast %1 : vector<8x1xf32> to vector<8x256xf32>
    %4 = vector.broadcast %2 : vector<1x256xf32> to vector<8x256xf32>
    %5 = arith.mulf %3, %4 : vector<8x256xf32>
    %6 = vector.extract_strided_slice %0 {offsets = [0, 1], sizes = [8, 1], strides = [1, 1]} : vector<8x16xf32> to vector<8x1xf32>
    %c1 = arith.constant 1 : index
    %c0_3 = arith.constant 0 : index
    %7 = vector.load %arg2[%c1, %c0_3] : memref<16x256xf32, #tpu.memory_space<vmem>>, vector<1x256xf32>
    %8 = vector.broadcast %6 : vector<8x1xf32> to vector<8x256xf32>
    %9 = vector.broadcast %7 : vector<1x256xf32> to vector<8x256xf32>
    %10 = arith.mulf %8, %9 : vector<8x256xf32>
    %11 = arith.addf %5, %10 : vector<8x256xf32>
    %12 = vector.extract_strided_slice %0 {offsets = [0, 2], sizes = [8, 1], strides = [1, 1]} : vector<8x16xf32> to vector<8x1xf32>
    %c2 = arith.constant 2 : index
    %c0_4 = arith.constant 0 : index
    %13 = vector.load %arg2[%c2, %c0_4] : memref<16x256xf32, #tpu.memory_space<vmem>>, vector<1x256xf32>
    %14 = vector.broadcast %12 : vector<8x1xf32> to vector<8x256xf32>
    %15 = vector.broadcast %13 : vector<1x256xf32> to vector<8x256xf32>
    %16 = arith.mulf %14, %15 : vector<8x256xf32>
    %17 = arith.addf %11, %16 : vector<8x256xf32>
    %18 = vector.extract_strided_slice %0 {offsets = [0, 3], sizes = [8, 1], strides = [1, 1]} : vector<8x16xf32> to vector<8x1xf32>
    %c3 = arith.constant 3 : index
    %c0_5 = arith.constant 0 : index
    %19 = vector.load %arg2[%c3, %c0_5] : memref<16x256xf32, #tpu.memory_space<vmem>>, vector<1x256xf32>
    %20 = vector.broadcast %18 : vector<8x1xf32> to vector<8x256xf32>
    %21 = vector.broadcast %19 : vector<1x256xf32> to vector<8x256xf32>
    %22 = arith.mulf %20, %21 : vector<8x256xf32>
    %23 = arith.addf %17, %22 : vector<8x256xf32>
    %24 = vector.extract_strided_slice %0 {offsets = [0, 4], sizes = [8, 1], strides = [1, 1]} : vector<8x16xf32> to vector<8x1xf32>
    %c4 = arith.constant 4 : index
    %c0_6 = arith.constant 0 : index
    %25 = vector.load %arg2[%c4, %c0_6] : memref<16x256xf32, #tpu.memory_space<vmem>>, vector<1x256xf32>
    %26 = vector.broadcast %24 : vector<8x1xf32> to vector<8x256xf32>
    %27 = vector.broadcast %25 : vector<1x256xf32> to vector<8x256xf32>
    %28 = arith.mulf %26, %27 : vector<8x256xf32>
    %29 = arith.addf %23, %28 : vector<8x256xf32>
    %30 = vector.extract_strided_slice %0 {offsets = [0, 5], sizes = [8, 1], strides = [1, 1]} : vector<8x16xf32> to vector<8x1xf32>
    %c5 = arith.constant 5 : index
    %c0_7 = arith.constant 0 : index
    %31 = vector.load %arg2[%c5, %c0_7] : memref<16x256xf32, #tpu.memory_space<vmem>>, vector<1x256xf32>
    %32 = vector.broadcast %30 : vector<8x1xf32> to vector<8x256xf32>
    %33 = vector.broadcast %31 : vector<1x256xf32> to vector<8x256xf32>
    %34 = arith.mulf %32, %33 : vector<8x256xf32>
    %35 = arith.addf %29, %34 : vector<8x256xf32>
    %36 = vector.extract_strided_slice %0 {offsets = [0, 6], sizes = [8, 1], strides = [1, 1]} : vector<8x16xf32> to vector<8x1xf32>
    %c6 = arith.constant 6 : index
    %c0_8 = arith.constant 0 : index
    %37 = vector.load %arg2[%c6, %c0_8] : memref<16x256xf32, #tpu.memory_space<vmem>>, vector<1x256xf32>
    %38 = vector.broadcast %36 : vector<8x1xf32> to vector<8x256xf32>
    %39 = vector.broadcast %37 : vector<1x256xf32> to vector<8x256xf32>
    %40 = arith.mulf %38, %39 : vector<8x256xf32>
    %41 = arith.addf %35, %40 : vector<8x256xf32>
    %42 = vector.extract_strided_slice %0 {offsets = [0, 7], sizes = [8, 1], strides = [1, 1]} : vector<8x16xf32> to vector<8x1xf32>
    %c7 = arith.constant 7 : index
    %c0_9 = arith.constant 0 : index
    %43 = vector.load %arg2[%c7, %c0_9] : memref<16x256xf32, #tpu.memory_space<vmem>>, vector<1x256xf32>
    %44 = vector.broadcast %42 : vector<8x1xf32> to vector<8x256xf32>
    %45 = vector.broadcast %43 : vector<1x256xf32> to vector<8x256xf32>
    %46 = arith.mulf %44, %45 : vector<8x256xf32>
    %47 = arith.addf %41, %46 : vector<8x256xf32>
    %48 = vector.extract_strided_slice %0 {offsets = [0, 8], sizes = [8, 1], strides = [1, 1]} : vector<8x16xf32> to vector<8x1xf32>
    %c8 = arith.constant 8 : index
    %c0_10 = arith.constant 0 : index
    %49 = vector.load %arg2[%c8, %c0_10] : memref<16x256xf32, #tpu.memory_space<vmem>>, vector<1x256xf32>
    %50 = vector.broadcast %48 : vector<8x1xf32> to vector<8x256xf32>
    %51 = vector.broadcast %49 : vector<1x256xf32> to vector<8x256xf32>
    %52 = arith.mulf %50, %51 : vector<8x256xf32>
    %53 = arith.addf %47, %52 : vector<8x256xf32>
    %54 = vector.extract_strided_slice %0 {offsets = [0, 9], sizes = [8, 1], strides = [1, 1]} : vector<8x16xf32> to vector<8x1xf32>
    %c9 = arith.constant 9 : index
    %c0_11 = arith.constant 0 : index
    %55 = vector.load %arg2[%c9, %c0_11] : memref<16x256xf32, #tpu.memory_space<vmem>>, vector<1x256xf32>
    %56 = vector.broadcast %54 : vector<8x1xf32> to vector<8x256xf32>
    %57 = vector.broadcast %55 : vector<1x256xf32> to vector<8x256xf32>
    %58 = arith.mulf %56, %57 : vector<8x256xf32>
    %59 = arith.addf %53, %58 : vector<8x256xf32>
    %60 = vector.extract_strided_slice %0 {offsets = [0, 10], sizes = [8, 1], strides = [1, 1]} : vector<8x16xf32> to vector<8x1xf32>
    %c10 = arith.constant 10 : index
    %c0_12 = arith.constant 0 : index
    %61 = vector.load %arg2[%c10, %c0_12] : memref<16x256xf32, #tpu.memory_space<vmem>>, vector<1x256xf32>
    %62 = vector.broadcast %60 : vector<8x1xf32> to vector<8x256xf32>
    %63 = vector.broadcast %61 : vector<1x256xf32> to vector<8x256xf32>
    %64 = arith.mulf %62, %63 : vector<8x256xf32>
    %65 = arith.addf %59, %64 : vector<8x256xf32>
    %66 = vector.extract_strided_slice %0 {offsets = [0, 11], sizes = [8, 1], strides = [1, 1]} : vector<8x16xf32> to vector<8x1xf32>
    %c11 = arith.constant 11 : index
    %c0_13 = arith.constant 0 : index
    %67 = vector.load %arg2[%c11, %c0_13] : memref<16x256xf32, #tpu.memory_space<vmem>>, vector<1x256xf32>
    %68 = vector.broadcast %66 : vector<8x1xf32> to vector<8x256xf32>
    %69 = vector.broadcast %67 : vector<1x256xf32> to vector<8x256xf32>
    %70 = arith.mulf %68, %69 : vector<8x256xf32>
    %71 = arith.addf %65, %70 : vector<8x256xf32>
    %72 = vector.extract_strided_slice %0 {offsets = [0, 12], sizes = [8, 1], strides = [1, 1]} : vector<8x16xf32> to vector<8x1xf32>
    %c12 = arith.constant 12 : index
    %c0_14 = arith.constant 0 : index
    %73 = vector.load %arg2[%c12, %c0_14] : memref<16x256xf32, #tpu.memory_space<vmem>>, vector<1x256xf32>
    %74 = vector.broadcast %72 : vector<8x1xf32> to vector<8x256xf32>
    %75 = vector.broadcast %73 : vector<1x256xf32> to vector<8x256xf32>
    %76 = arith.mulf %74, %75 : vector<8x256xf32>
    %77 = arith.addf %71, %76 : vector<8x256xf32>
    %78 = vector.extract_strided_slice %0 {offsets = [0, 13], sizes = [8, 1], strides = [1, 1]} : vector<8x16xf32> to vector<8x1xf32>
    %c13 = arith.constant 13 : index
    %c0_15 = arith.constant 0 : index
    %79 = vector.load %arg2[%c13, %c0_15] : memref<16x256xf32, #tpu.memory_space<vmem>>, vector<1x256xf32>
    %80 = vector.broadcast %78 : vector<8x1xf32> to vector<8x256xf32>
    %81 = vector.broadcast %79 : vector<1x256xf32> to vector<8x256xf32>
    %82 = arith.mulf %80, %81 : vector<8x256xf32>
    %83 = arith.addf %77, %82 : vector<8x256xf32>
    %84 = vector.extract_strided_slice %0 {offsets = [0, 14], sizes = [8, 1], strides = [1, 1]} : vector<8x16xf32> to vector<8x1xf32>
    %c14 = arith.constant 14 : index
    %c0_16 = arith.constant 0 : index
    %85 = vector.load %arg2[%c14, %c0_16] : memref<16x256xf32, #tpu.memory_space<vmem>>, vector<1x256xf32>
    %86 = vector.broadcast %84 : vector<8x1xf32> to vector<8x256xf32>
    %87 = vector.broadcast %85 : vector<1x256xf32> to vector<8x256xf32>
    %88 = arith.mulf %86, %87 : vector<8x256xf32>
    %89 = arith.addf %83, %88 : vector<8x256xf32>
    %90 = vector.extract_strided_slice %0 {offsets = [0, 15], sizes = [8, 1], strides = [1, 1]} : vector<8x16xf32> to vector<8x1xf32>
    %c15 = arith.constant 15 : index
    %c0_17 = arith.constant 0 : index
    %91 = vector.load %arg2[%c15, %c0_17] : memref<16x256xf32, #tpu.memory_space<vmem>>, vector<1x256xf32>
    %92 = vector.broadcast %90 : vector<8x1xf32> to vector<8x256xf32>
    %93 = vector.broadcast %91 : vector<1x256xf32> to vector<8x256xf32>
    %94 = arith.mulf %92, %93 : vector<8x256xf32>
    %95 = arith.addf %89, %94 : vector<8x256xf32>
    %c0_18 = arith.constant 0 : index
    %c0_19 = arith.constant 0 : index
    %96 = vector.load %arg3[%c0_18, %c0_19] : memref<1x256xf32, #tpu.memory_space<vmem>>, vector<1x256xf32>
    %97 = vector.broadcast %96 : vector<1x256xf32> to vector<8x256xf32>
    %98 = arith.addf %95, %97 : vector<8x256xf32>
    %cst = arith.constant 0.000000e+00 : f32
    %99 = vector.broadcast %cst : f32 to vector<8x256xf32>
    %100 = arith.maximumf %98, %99 : vector<8x256xf32>
    %101 = arith.truncf %100 : vector<8x256xf32> to vector<8x256xbf16>
    %c0_20 = arith.constant 0 : index
    %c0_21 = arith.constant 0 : index
    %102 = vector.load %arg4[%c0_20, %c0_21] : memref<256x256xbf16, #tpu.memory_space<vmem>>, vector<256x256xbf16>
    %cst_22 = arith.constant dense<0.000000e+00> : vector<8x256xf32>
    %103 = tpu.matmul %101, %102, %cst_22 {dimension_numbers = #tpu.dot_dimension_numbers<[1], [0], [0], [1], [0, 0, 1, 1], [], []>} : vector<8x256xbf16>, vector<256x256xbf16>, vector<8x256xf32> -> vector<8x256xf32>
    %c0_23 = arith.constant 0 : index
    %c0_24 = arith.constant 0 : index
    %104 = vector.load %arg5[%c0_23, %c0_24] : memref<1x256xf32, #tpu.memory_space<vmem>>, vector<1x256xf32>
    %105 = vector.broadcast %104 : vector<1x256xf32> to vector<8x256xf32>
    %106 = arith.addf %103, %105 : vector<8x256xf32>
    %cst_25 = arith.constant 0.000000e+00 : f32
    %107 = vector.broadcast %cst_25 : f32 to vector<8x256xf32>
    %108 = arith.maximumf %106, %107 : vector<8x256xf32>
    %109 = arith.truncf %108 : vector<8x256xf32> to vector<8x256xbf16>
    %c0_26 = arith.constant 0 : index
    %c0_27 = arith.constant 0 : index
    %110 = vector.load %arg6[%c0_26, %c0_27] : memref<256x8xbf16, #tpu.memory_space<vmem>>, vector<256x8xbf16>
    %cst_28 = arith.constant dense<0.000000e+00> : vector<8x8xf32>
    %111 = tpu.matmul %109, %110, %cst_28 {dimension_numbers = #tpu.dot_dimension_numbers<[1], [0], [0], [1], [0, 0, 1, 1], [], []>} : vector<8x256xbf16>, vector<256x8xbf16>, vector<8x8xf32> -> vector<8x8xf32>
    %c0_29 = arith.constant 0 : index
    %c0_30 = arith.constant 0 : index
    %112 = vector.load %arg7[%c0_29, %c0_30] : memref<1x8xf32, #tpu.memory_space<vmem>>, vector<1x8xf32>
    %113 = vector.broadcast %112 : vector<1x8xf32> to vector<8x8xf32>
    %114 = arith.addf %111, %113 : vector<8x8xf32>
    %c0_31 = arith.constant 0 : index
    %c0_32 = arith.constant 0 : index
    %115 = vector.load %arg8[%c0_31, %c0_32] : memref<8x8xf32, #tpu.memory_space<vmem>>, vector<8x8xf32>
    tpu.vector_store %arg8[%c0_31, %c0_32], %114 {strides = array<i32>} : memref<8x8xf32, #tpu.memory_space<vmem>>, vector<8x8xf32>,
    return
  }
  func.func @transform_0(%arg0: i32) -> (i32, i32) {
    %c0_i32 = arith.constant 0 : i32
    %c0_i32_0 = arith.constant 0 : i32
    return %arg0, %c0_i32 : i32, i32
  }
  func.func @transform_1(%arg0: i32) -> (i32, i32) {
    %c0_i32 = arith.constant 0 : i32
    %c0_i32_0 = arith.constant 0 : i32
    %c0_i32_1 = arith.constant 0 : i32
    return %c0_i32, %c0_i32_0 : i32, i32
  }
  func.func @transform_2(%arg0: i32) -> (i32, i32) {
    %c0_i32 = arith.constant 0 : i32
    %c0_i32_0 = arith.constant 0 : i32
    %c0_i32_1 = arith.constant 0 : i32
    return %c0_i32, %c0_i32_0 : i32, i32
  }
  func.func @transform_3(%arg0: i32) -> (i32, i32) {
    %c0_i32 = arith.constant 0 : i32
    %c0_i32_0 = arith.constant 0 : i32
    %c0_i32_1 = arith.constant 0 : i32
    return %c0_i32, %c0_i32_0 : i32, i32
  }
  func.func @transform_4(%arg0: i32) -> (i32, i32) {
    %c0_i32 = arith.constant 0 : i32
    %c0_i32_0 = arith.constant 0 : i32
    %c0_i32_1 = arith.constant 0 : i32
    return %c0_i32, %c0_i32_0 : i32, i32
  }
  func.func @transform_5(%arg0: i32) -> (i32, i32) {
    %c0_i32 = arith.constant 0 : i32
    %c0_i32_0 = arith.constant 0 : i32
    %c0_i32_1 = arith.constant 0 : i32
    return %c0_i32, %c0_i32_0 : i32, i32
  }
  func.func @transform_6(%arg0: i32) -> (i32, i32) {
    %c0_i32 = arith.constant 0 : i32
    %c0_i32_0 = arith.constant 0 : i32
    %c0_i32_1 = arith.constant 0 : i32
    return %c0_i32, %c0_i32_0 : i32, i32
  }
  func.func @transform_7(%arg0: i32) -> (i32, i32) {
    %c0_i32 = arith.constant 0 : i32
    %c0_i32_0 = arith.constant 0 : i32
    return %arg0, %c0_i32 : i32, i32
  }
}

</mosaic_0001>

<bundles_post_ra>
// kernel: qnetwork_forward.1
= control target key start
LH: loop header
LB: loop body
LE: loop exit
PB: predicated region body
PF: predicated region fallthrough
CT: control target
= control target key end

     0   :  { %v993_v0 = vmov 2   ;;  %v994_v1 = vmov 0   ;;  %v995_v6 = vmov 3   ;;  %v996_v7 = vmov 1   ;;  %s1314_s0 = inlined_call_operand.vmem [shape: f32[8,16], index: 0, kind: input, shape index: {}]   ;;  %s1315_s3 = inlined_call_operand.vmem [shape: bf16[256,256], index: 3, kind: input, shape index: {}]   ;;  %s1316_s5 = inlined_call_operand.vmem [shape: bf16[256,8], index: 5, kind: input, shape index: {}]   ;;  %s1317_s1 = inlined_call_operand.vmem [shape: f32[16,256], index: 1, kind: input, shape index: {}]   ;;  %s1318_s2 = inlined_call_operand.vmem [shape: f32[1,256], index: 2, kind: input, shape index: {}]   ;;  %s1319_s4 = inlined_call_operand.vmem [shape: f32[1,256], index: 4, kind: input, shape index: {}]   ;;  %s1320_s6 = inlined_call_operand.vmem [shape: f32[1,8], index: 6, kind: input, shape index: {}]   ;;  %s1321_s7 = inlined_call_operand.vmem [shape: f32[8,8], index: 7, kind: output, shape index: {}]  }
   0x1   :  { %914 = vset.pattern.permute.xlu1 %v993_v0  ;;  %912 = vset.pattern.permute.xlu0 %v994_v1  ;;  %v1052_v2 = vld [vmem:[%s1314_s0] sm:$0xff]  ;;  %v932_v5 = vld [vmem:[%s1315_s3 + $0x14] ss:$8 sps:$4 sm:$0xff]   ;;  %v934_v8 = vld [vmem:[%s1315_s3 + $0x10] ss:$8 sps:$4 sm:$0xff]   ;;  %v997_v10 = vmov 4   ;;  %v35_v61 = vlaneseq }
   0x2   :  { %71 = vperm.xlu1 %914, %v1052_v2   ;;  %31 = vperm.xlu0 %912, %v1052_v2   ;;  %v929_v3 = vld [vmem:[%s1315_s3 + $0x4] ss:$8 sps:$4 sm:$0xff]   ;;  %v931_v4 = vld [vmem:[%s1315_s3] ss:$8 sps:$4 sm:$0xff]   ;;  %v998_v11 = vmov 5   ;;  %v999_v14 = vmov 6  }
   0x3   :  { %584 = vmatprep.subr.bf16.mxu0 %v929_v3  ;;  %v935_v9 = vld [vmem:[%s1315_s3 + $0x24] ss:$8 sps:$4 sm:$0xff]   ;;  %v937_v12 = vld [vmem:[%s1315_s3 + $0x20] ss:$8 sps:$4 sm:$0xff]   ;;  %v938_v13 = vld [vmem:[%s1315_s3 + $0x34] ss:$8 sps:$4 sm:$0xff]  }
   0x4   :  { %585 = vmatpush1.bf16.msra.mxu0 %v931_v4  ;;  %v1000_v15 = vmov 8   ;;  %v940_v16 = vld [vmem:[%s1315_s3 + $0x30] ss:$8 sps:$4 sm:$0xff]   ;;  %v941_v17 = vld [vmem:[%s1315_s3 + $0x44] ss:$8 sps:$4 sm:$0xff]   ;;  %v1001_v18 = vmov 7  }
   0x5   :  { %586 = vmatprep.subr.bf16.mxu0 %v932_v5  ;;  %v1002_v19 = vmov 11   ;;  %v943_v20 = vld [vmem:[%s1315_s3 + $0x40] ss:$8 sps:$4 sm:$0xff]   ;;  %v944_v21 = vld [vmem:[%s1315_s3 + $0x54] ss:$8 sps:$4 sm:$0xff]   ;;  %v1003_v22 = vmov 9  }
   0x6   :  { %915 = vset.pattern.permute.xlu1 %v995_v6  ;;  %913 = vset.pattern.permute.xlu0 %v996_v7  ;;  %v1004_v23 = vmov 14   ;;  %v946_v24 = vld [vmem:[%s1315_s3 + $0x50] ss:$8 sps:$4 sm:$0xff]   ;;  %v947_v25 = vld [vmem:[%s1315_s3 + $0x64] ss:$8 sps:$4 sm:$0xff]   ;;  %v1005_v26 = vmov 10  }
   0x7   :  { %92 = vperm.xlu1 %915, %v1052_v2   ;;  %50 = vperm.xlu0 %913, %v1052_v2   ;;  %v1006_v27 = vmov 15   ;;  %v949_v28 = vld [vmem:[%s1315_s3 + $0x60] ss:$8 sps:$4 sm:$0xff]   ;;  %v950_v29 = vld [vmem:[%s1315_s3 + $0x74] ss:$8 sps:$4 sm:$0xff]   ;;  %v1007_v30 = vmov 12  }
   0x8   :  { %587 = vmatpush1.bf16.msra.mxu0 %v934_v8  ;;  %v952_v31 = vld [vmem:[%s1315_s3 + $0x70] ss:$8 sps:$4 sm:$0xff]   ;;  %v953_v32 = vld [vmem:[%s1315_s3 + $0x84] ss:$8 sps:$4 sm:$0xff]   ;;  %v955_v33 = vld [vmem:[%s1315_s3 + $0x80] ss:$8 sps:$4 sm:$0xff]  }
   0x9   :  { %588 = vmatprep.subr.bf16.mxu0 %v935_v9  ;;  %v1008_v34 = vmov 13   ;;  %v956_v35 = vld [vmem:[%s1315_s3 + $0x94] ss:$8 sps:$4 sm:$0xff]   ;;  %v958_v36 = vld [vmem:[%s1315_s3 + $0x90] ss:$8 sps:$4 sm:$0xff]   ;;  %v977_v46 = vld [vmem:[%s1316_s5 + $0x40] sm:$0xff]  }
   0xa   :  { %v959_v37 = vld [vmem:[%s1315_s3 + $0xa4] ss:$8 sps:$4 sm:$0xff]   ;;  %v961_v38 = vld [vmem:[%s1315_s3 + $0xa0] ss:$8 sps:$4 sm:$0xff]   ;;  %v962_v39 = vld [vmem:[%s1315_s3 + $0xb4] ss:$8 sps:$4 sm:$0xff]   ;;  %874 = vmatprep.subr.bf16.mxu1 %v977_v46 }
   0xb   :  { %916 = vset.pattern.permute.xlu1 %v997_v10  ;;  %917 = vset.pattern.permute.xlu0 %v998_v11  ;;  %v964_v40 = vld [vmem:[%s1315_s3 + $0xb0] ss:$8 sps:$4 sm:$0xff]   ;;  %v965_v41 = vld [vmem:[%s1315_s3 + $0xc4] ss:$8 sps:$4 sm:$0xff]   ;;  %v967_v42 = vld [vmem:[%s1315_s3 + $0xc0] ss:$8 sps:$4 sm:$0xff]  }
   0xc   :  { %113 = vperm.xlu1 %916, %v1052_v2   ;;  %134 = vperm.xlu0 %917, %v1052_v2   ;;  %v968_v43 = vld [vmem:[%s1315_s3 + $0xd4] ss:$8 sps:$4 sm:$0xff]   ;;  %v970_v44 = vld [vmem:[%s1315_s3 + $0xd0] ss:$8 sps:$4 sm:$0xff]   ;;  %v971_v45 = vld [vmem:[%s1315_s3 + $0xe4] ss:$8 sps:$4 sm:$0xff]  }
   0xd   :  { %589 = vmatpush1.bf16.msra.mxu0 %v937_v12  ;;  %v978_v47 = vld [vmem:[%s1316_s5] sm:$0xff]   ;;  %v979_v48 = vld [vmem:[%s1316_s5 + $0x48] sm:$0xff]   ;;  %v981_v50 = vld [vmem:[%s1316_s5 + $0x50] sm:$0xff]   ;;  %v36_v62 = vshrl.u32 %v35_v61, 7  ;;  %vm804_vm0 = vcmask 64512  }
   0xe   :  { %590 = vmatprep.subr.bf16.mxu0 %v938_v13  ;;  %875 = vmatpush3.bf16.msra.mxu1 %v978_v47  ;;  %v980_v49 = vld [vmem:[%s1316_s5 + $0x8] sm:$0xff]   ;;  %v974_v52 = vld [vmem:[%s1315_s3 + $0xf4] ss:$8 sps:$4 sm:$0xff]   ;;  %v976_v55 = vld [vmem:[%s1315_s3 + $0xf0] ss:$8 sps:$4 sm:$0xff]  }
   0xf   :  { %876 = vmatprep.subr.bf16.mxu1 %v979_v48  ;;  %v973_v51 = vld [vmem:[%s1315_s3 + $0xe0] ss:$8 sps:$4 sm:$0xff]   ;;  %v982_v53 = vld [vmem:[%s1316_s5 + $0x10] sm:$0xff]   ;;  %v983_v54 = vld [vmem:[%s1316_s5 + $0x58] sm:$0xff]   ;;  %v1205_v0 = vsub.s32 0, %v36_v62  ;;  %v1207_v1 = vsub.s32 1, %v36_v62 }
  0x10   :  { %918 = vset.pattern.permute.xlu1 %v999_v14  ;;  %920 = vset.pattern.permute.xlu0 %v1000_v15  ;;  %v984_v56 = vld [vmem:[%s1316_s5 + $0x18] sm:$0xff]   ;;  %v985_v57 = vld [vmem:[%s1316_s5 + $0x60] sm:$0xff]   ;;  %v987_v59 = vld [vmem:[%s1316_s5 + $0x68] sm:$0xff]  }
  0x11   :  { %155 = vperm.xlu1 %918, %v1052_v2   ;;  %197 = vperm.xlu0 %920, %v1052_v2   ;;  %v986_v58 = vld [vmem:[%s1316_s5 + $0x20] sm:$0xff]   ;;  %v988_v60 = vld [vmem:[%s1316_s5 + $0x28] sm:$0xff]  }
  0x12   :  { %591 = vmatpush1.bf16.msra.mxu0 %v940_v16  ;;  %877 = vmatpush3.bf16.msra.mxu1 %v980_v49  ;;  %v28_v63 = vld [vmem:[%s1317_s1] ss:$8 sm:$0x3]  ;;  %v811_v7 = vld [vmem:[%s1317_s1 + $0x2] ss:$8 sm:$0x3] }
  0x13   :  { %592 = vmatprep.subr.bf16.mxu0 %v941_v17  ;;  %878 = vmatprep.subr.bf16.mxu1 %v981_v50  ;;  %v38_v4 = vrot.slane %v28_v63, %v1205_v0  ;;  %v42_v5 = vrot.slane %v28_v63, %v1207_v1  ;;  %v812_v10 = vld [vmem:[%s1317_s1 + $0x3] ss:$8 sm:$0x3]  ;;  %v78_v11 = vrot.slane %v811_v7, %v1205_v0  ;;  %v813_v15 = vld [vmem:[%s1317_s1 + $0x4] ss:$8 sm:$0x3] }
  0x14   :  { %v82_v12 = vrot.slane %v811_v7, %v1207_v1  ;;  %v816_v46 = vld [vmem:[%s1317_s1 + $0x7] ss:$8 sm:$0x3] }
  0x15   :  { %919 = vset.pattern.permute.xlu1 %v1001_v18  ;;  %923 = vset.pattern.permute.xlu0 %v1002_v19  ;;  %v99_v18 = vrot.slane %v812_v10, %v1205_v0  ;;  %v103_v19 = vrot.slane %v812_v10, %v1207_v1  ;;  %v183_v50 = vrot.slane %v816_v46, %v1205_v0  ;;  %v819_v10 = vld [vmem:[%s1317_s1 + $0x12] ss:$8 sm:$0x3] }
  0x16   :  { %176 = vperm.xlu1 %919, %v1052_v2   ;;  %260 = vperm.xlu0 %923, %v1052_v2  }
  0x17   :  { %593 = vmatpush1.bf16.msra.mxu0 %v943_v20  ;;  %879 = vmatpush3.bf16.msra.mxu1 %v982_v53 }
  0x18   :  { %594 = vmatprep.subr.bf16.mxu0 %v944_v21  ;;  %880 = vmatprep.subr.bf16.mxu1 %v983_v54 }
  0x1a   :  { %921 = vset.pattern.permute.xlu1 %v1003_v22  ;;  %926 = vset.pattern.permute.xlu0 %v1004_v23  ;;  %v814_v22 = vld [vmem:[%s1317_s1 + $0x5] ss:$8 sm:$0x3]  ;;  %v120_v23 = vrot.slane %v813_v15, %v1205_v0 }
  0x1b   :  { %218 = vperm.xlu1 %921, %v1052_v2   ;;  %323 = vperm.xlu0 %926, %v1052_v2  }
  0x1c   :  { %595 = vmatpush1.bf16.msra.mxu0 %v946_v24  ;;  %881 = vmatpush3.bf16.msra.mxu1 %v984_v56  ;;  %v124_v24 = vrot.slane %v813_v15, %v1207_v1 }
  0x1d   :  { %596 = vmatprep.subr.bf16.mxu0 %v947_v25  ;;  %882 = vmatprep.subr.bf16.mxu1 %v985_v57 }
  0x1f   :  { %922 = vset.pattern.permute.xlu1 %v1005_v26  ;;  %928 = vset.pattern.permute.xlu0 %v1006_v27 }
  0x20   :  { %239 = vperm.xlu1 %922, %v1052_v2   ;;  %597 = vmatpush1.bf16.msra.mxu0 %v949_v28 }
  0x21   :  { %598 = vmatprep.subr.bf16.mxu0 %v950_v29  ;;  %883 = vmatpush3.bf16.msra.mxu1 %v986_v58  ;;  %v141_v29 = vrot.slane %v814_v22, %v1205_v0 }
  0x22   :  { %884 = vmatprep.subr.bf16.mxu1 %v987_v59  ;;  %v818_v59 = vld [vmem:[%s1317_s1 + $0x11] ss:$8 sm:$0x3] }
  0x24   :  { %924 = vset.pattern.permute.xlu1 %v1007_v30  ;;  %599 = vmatpush1.bf16.msra.mxu0 %v952_v31  ;;  %v145_v30 = vrot.slane %v814_v22, %v1207_v1 }
  0x25   :  { %281 = vperm.xlu1 %924, %v1052_v2   ;;  %600 = vmatprep.subr.bf16.mxu0 %v953_v32 }
  0x26   :  { %885 = vmatpush3.bf16.msra.mxu1 %v988_v60 }
  0x28   :  { %601 = vmatpush1.bf16.msra.mxu0 %v955_v33 }
  0x29   :  { %925 = vset.pattern.permute.xlu1 %v1008_v34  ;;  %602 = vmatprep.subr.bf16.mxu0 %v956_v35 }
  0x2a   :  { %302 = vperm.xlu1 %925, %v1052_v2  }
  0x2c   :  { %603 = vmatpush1.bf16.msra.mxu0 %v958_v36 }
  0x2d   :  { %604 = vmatprep.subr.bf16.mxu0 %v959_v37  ;;  %v815_v37 = vld [vmem:[%s1317_s1 + $0x6] ss:$8 sm:$0x3] }
  0x2e   :  { %927 = vset.pattern.permute.xlu1 %v1006_v27 }
  0x2f   :  { %344 = vperm.xlu1 %927, %v1052_v2   ;;  %v810_v2 = vld [vmem:[%s1317_s1 + $0x1] ss:$8 sm:$0x3] }
  0x30   :  { %605 = vmatpush1.bf16.msra.mxu0 %v961_v38  ;;  %v57_v8 = vrot.slane %v810_v2, %v1205_v0  ;;  %v61_v9 = vrot.slane %v810_v2, %v1207_v1 }
  0x31   :  { %606 = vmatprep.subr.bf16.mxu0 %v962_v39 }
  0x34   :  { %607 = vmatpush1.bf16.msra.mxu0 %v964_v40 }
  0x35   :  { %608 = vmatprep.subr.bf16.mxu0 %v965_v41 }
  0x38   :  { %609 = vmatpush1.bf16.msra.mxu0 %v967_v42 }
  0x39   :  { %610 = vmatprep.subr.bf16.mxu0 %v968_v43 }
  0x3c   :  { %611 = vmatpush1.bf16.msra.mxu0 %v970_v44  ;;  %v162_v44 = vrot.slane %v815_v37, %v1205_v0 }
  0x3d   :  { %612 = vmatprep.subr.bf16.mxu0 %v971_v45  ;;  %v166_v45 = vrot.slane %v815_v37, %v1207_v1 }
  0x40   :  { %613 = vmatpush1.bf16.msra.mxu0 %v973_v51  ;;  %v187_v51 = vrot.slane %v816_v46, %v1207_v1  ;;  %v824_v46 = vld [vmem:[%s1317_s1 + $0x17] ss:$8 sm:$0x3] }
  0x41   :  { %614 = vmatprep.subr.bf16.mxu0 %v974_v52  ;;  %v817_v52 = vld [vmem:[%s1317_s1 + $0x10] ss:$8 sm:$0x3] }
  0x42   :  { %v204_v57 = vrot.slane %v817_v52, %v1205_v0  ;;  %v208_v58 = vrot.slane %v817_v52, %v1207_v1 }
  0x44   :  { %615 = vmatpush1.bf16.msra.mxu0 %v976_v55 }
  0x81   :  { %v72_v3 = vpop.permute.xlu1 %71  ;;  %v32_v6 = vpop.permute.xlu0 %31 }
  0x82   :  { %v45_v13 = vmul.f32 %v38_v4, %v32_v6  ;;  %v46_v14 = vmul.f32 %v42_v5, %v32_v6  ;;  %v85_v25 = vmul.f32 %v78_v11, %v72_v3  ;;  %v86_v26 = vmul.f32 %v82_v12, %v72_v3 }
  0x83   :  { %v225_v4 = vrot.slane %v818_v59, %v1205_v0  ;;  %v229_v5 = vrot.slane %v818_v59, %v1207_v1  ;;  %v246_v12 = vrot.slane %v819_v10, %v1205_v0 }
  0x86   :  { %v93_v16 = vpop.permute.xlu1 %92  ;;  %v51_v17 = vpop.permute.xlu0 %50 }
  0x87   :  { %v64_v20 = vmul.f32 %v57_v8, %v51_v17  ;;  %v65_v21 = vmul.f32 %v61_v9, %v51_v17  ;;  %v106_v31 = vmul.f32 %v99_v18, %v93_v16  ;;  %v107_v32 = vmul.f32 %v103_v19, %v93_v16 }
  0x89   :  { %v66_v27 = vadd.f32 %v64_v20, %v45_v13  ;;  %v67_v28 = vadd.f32 %v65_v21, %v46_v14  ;;  %v250_v13 = vrot.slane %v819_v10, %v1207_v1  ;;  %v820_v14 = vld [vmem:[%s1317_s1 + $0x13] ss:$8 sm:$0x3]  ;;  %v821_v21 = vld [vmem:[%s1317_s1 + $0x14] ss:$8 sm:$0x3] }
  0x8a   :  { %v267_v19 = vrot.slane %v820_v14, %v1205_v0  ;;  %v271_v20 = vrot.slane %v820_v14, %v1207_v1  ;;  %v991_v14 = vld [vmem:[%s1316_s5 + $0x78] sm:$0xff]  }
  0x8b   :  { %v87_v33 = vadd.f32 %v85_v25, %v66_v27  ;;  %v88_v34 = vadd.f32 %v86_v26, %v67_v28  ;;  %v114_v35 = vpop.permute.xlu1 %113  ;;  %v135_v36 = vpop.permute.xlu0 %134  ;;  %v288_v28 = vrot.slane %v821_v21, %v1205_v0 }
  0x8c   :  { %v127_v38 = vmul.f32 %v120_v23, %v114_v35  ;;  %v128_v39 = vmul.f32 %v124_v24, %v114_v35  ;;  %v148_v42 = vmul.f32 %v141_v29, %v135_v36  ;;  %v149_v43 = vmul.f32 %v145_v30, %v135_v36  ;;  %v823_v35 = vld [vmem:[%s1317_s1 + $0x16] ss:$8 sm:$0x3] }
  0x8d   :  { %v108_v40 = vadd.f32 %v106_v31, %v87_v33  ;;  %v109_v41 = vadd.f32 %v107_v32, %v88_v34  ;;  %v292_v29 = vrot.slane %v821_v21, %v1207_v1  ;;  %v822_v34 = vld [vmem:[%s1317_s1 + $0x15] ss:$8 sm:$0x3] }
  0x8e   :  { %v309_v37 = vrot.slane %v822_v34, %v1205_v0 }
  0x8f   :  { %v129_v47 = vadd.f32 %v127_v38, %v108_v40  ;;  %v130_v48 = vadd.f32 %v128_v39, %v109_v41  ;;  %v313_v38 = vrot.slane %v822_v34, %v1207_v1  ;;  %v330_v39 = vrot.slane %v823_v35, %v1205_v0 }
  0x90   :  { %v156_v49 = vpop.permute.xlu1 %155  ;;  %v198_v61 = vpop.permute.xlu0 %197  ;;  %v334_v40 = vrot.slane %v823_v35, %v1207_v1 }
  0x91   :  { %v150_v53 = vadd.f32 %v148_v42, %v129_v47  ;;  %v151_v54 = vadd.f32 %v149_v43, %v130_v48  ;;  %v169_v55 = vmul.f32 %v162_v44, %v156_v49  ;;  %v170_v56 = vmul.f32 %v166_v45, %v156_v49 }
  0x92   :  { %v211_v8 = vmul.f32 %v204_v57, %v198_v61  ;;  %v212_v9 = vmul.f32 %v208_v58, %v198_v61  ;;  %v362_v58 = vld [vmem:[%s1318_s2] sm:$0x3] }
  0x93   :  { %v171_v62 = vadd.f32 %v169_v55, %v150_v53  ;;  %v172_v63 = vadd.f32 %v170_v56, %v151_v54  ;;  %v351_v54 = vrot.slane %v824_v46, %v1205_v0  ;;  %v355_v55 = vrot.slane %v824_v46, %v1207_v1 }
  0x95   :  { %v177_v60 = vpop.permute.xlu1 %176  ;;  %v261_v23 = vpop.permute.xlu0 %260 }
  0x96   :  { %v190_v2 = vmul.f32 %v183_v50, %v177_v60  ;;  %v191_v3 = vmul.f32 %v187_v51, %v177_v60  ;;  %v274_v32 = vmul.f32 %v267_v19, %v261_v23  ;;  %v275_v33 = vmul.f32 %v271_v20, %v261_v23 }
  0x98   :  { %v192_v6 = vadd.f32 %v190_v2, %v171_v62  ;;  %v193_v7 = vadd.f32 %v191_v3, %v172_v63  ;;  %v367_v2 = vrot.slane %v362_v58, %v1205_v0  ;;  %v371_v3 = vrot.slane %v362_v58, %v1207_v1 }
  0x9a   :  { %v219_v11 = vpop.permute.xlu1 %218  ;;  %v213_v15 = vadd.f32 %v211_v8, %v192_v6  ;;  %v214_v16 = vadd.f32 %v212_v9, %v193_v7  ;;  %v324_v45 = vpop.permute.xlu0 %323 }
  0x9b   :  { %v232_v17 = vmul.f32 %v225_v4, %v219_v11  ;;  %v233_v18 = vmul.f32 %v229_v5, %v219_v11  ;;  %v337_v48 = vmul.f32 %v330_v39, %v324_v45  ;;  %v338_v49 = vmul.f32 %v334_v40, %v324_v45 }
  0x9d   :  { %v234_v24 = vadd.f32 %v232_v17, %v213_v15  ;;  %v235_v25 = vadd.f32 %v233_v18, %v214_v16  ;;  %v992_v15 = vld [vmem:[%s1316_s5 + $0x38] sm:$0xff]   ;;  %v412_v16 = vld [vmem:[%s1319_s4] sm:$0x3] }
  0x9e   :  { %v417_v17 = vrot.slane %v412_v16, %v1205_v0  ;;  %v421_v18 = vrot.slane %v412_v16, %v1207_v1 }
  0x9f   :  { %v240_v22 = vpop.permute.xlu1 %239 }
  0xa0   :  { %v253_v26 = vmul.f32 %v246_v12, %v240_v22  ;;  %v254_v27 = vmul.f32 %v250_v13, %v240_v22  ;;  %v989_v12 = vld [vmem:[%s1316_s5 + $0x70] sm:$0xff]  }
  0xa1   :  { %v990_v13 = vld [vmem:[%s1316_s5 + $0x30] sm:$0xff]   ;;  %886 = vmatprep.subr.bf16.mxu1 %v989_v12 }
  0xa2   :  { %v255_v30 = vadd.f32 %v253_v26, %v234_v24  ;;  %v256_v31 = vadd.f32 %v254_v27, %v235_v25  ;;  %887 = vmatpush3.bf16.msra.mxu1 %v990_v13 }
  0xa3   :  { %888 = vmatprep.subr.bf16.mxu1 %v991_v14 }
  0xa4   :  { %v282_v36 = vpop.permute.xlu1 %281  ;;  %v276_v41 = vadd.f32 %v274_v32, %v255_v30  ;;  %v277_v42 = vadd.f32 %v275_v33, %v256_v31  ;;  %v857_v30 = vld [vmem:[%s1320_s6] ss:$0 sm:$0xff] }
  0xa5   :  { %v295_v43 = vmul.f32 %v288_v28, %v282_v36  ;;  %v296_v44 = vmul.f32 %v292_v29, %v282_v36 }
  0xa6   :  { %889 = vmatpush3.bf16.msra.mxu1 %v992_v15 }
  0xa7   :  { %v297_v50 = vadd.f32 %v295_v43, %v276_v41  ;;  %v298_v51 = vadd.f32 %v296_v44, %v277_v42 }
  0xa9   :  { %v303_v47 = vpop.permute.xlu1 %302 }
  0xaa   :  { %v316_v52 = vmul.f32 %v309_v37, %v303_v47  ;;  %v317_v53 = vmul.f32 %v313_v38, %v303_v47 }
  0xac   :  { %v318_v56 = vadd.f32 %v316_v52, %v297_v50  ;;  %v319_v57 = vadd.f32 %v317_v53, %v298_v51 }
  0xae   :  { %v339_v59 = vadd.f32 %v337_v48, %v318_v56  ;;  %v340_v60 = vadd.f32 %v338_v49, %v319_v57  ;;  %v345_v61 = vpop.permute.xlu1 %344 }
  0xaf   :  { %v358_v62 = vmul.f32 %v351_v54, %v345_v61  ;;  %v359_v63 = vmul.f32 %v355_v55, %v345_v61 }
  0xb1   :  { %v360_v4 = vadd.f32 %v358_v62, %v339_v59  ;;  %v361_v5 = vadd.f32 %v359_v63, %v340_v60 }
  0xb3   :  { %v375_v6 = vadd.f32 %v371_v3, %v361_v5  ;;  %v374_v7 = vadd.f32 %v367_v2, %v360_v4 }
  0xb5   :  { %v377_v8 = vmax.f32 %v375_v6, 0.0  ;;  %v376_v9 = vmax.f32 %v374_v7, 0.0 }
  0xb7   :  { %v379_v10 = vpack.c.bf16 %v377_v8, %v377_v8  ;;  %v378_v11 = vpack.c.bf16 %v376_v9, %v376_v9 }
  0xb9   :  { %616 = vmatprep.mubr.bf16.mxu0 %v379_v10 }
  0xba   :  { %617 = vmatmul.mubr.bf16.vlgmr.msra.gmra.mrb[0].mxu0 %v378_v11 }
 0x18d   :  { %v618_v19 = vpop.f32.mrb[0].mxu0 }
 0x18e   :  { %v619_v20 = vadd.f32 %v618_v19, %v417_v17  ;;  %v620_v21 = vpop.f32.mrb[1].mxu0 }
 0x18f   :  { %v621_v22 = vadd.f32 %v620_v21, %v421_v18  ;;  %v622_v23 = vpop.f32.mrb[2].mxu0 }
 0x190   :  { %v625_v24 = vmax.f32 %v619_v20, 0.0  ;;  %v623_v25 = vpop.f32.mrb[3].mxu0 }
 0x191   :  { %v626_v26 = vmax.f32 %v621_v22, 0.0 }
 0x192   :  { %v627_v28 = vpack.c.bf16 %v625_v24, %v625_v24 }
 0x193   :  { %v628_v27 = vpack.c.bf16 %v626_v26, %v626_v26 }
 0x195   :  { %796 = vmatprep.mubr.bf16.mxu1 %v628_v27 }
 0x196   :  { %797 = vmatmul.mubr.bf16.vlgmr.msra.gmra.mrb[0].mxu1 %v627_v28 }
 0x269   :  { %v890_v29 = vpop.f32.mrb[0].mxu1 }
 0x26a   :  { %v891_v0 = vpop.f32.mrb[1].mxu1 }
 0x26b   :  { %v892_v31 = vadd.f32 %v891_v0, %v890_v29  ;;  %v893_v1 = vpop.f32.mrb[2].mxu1 }
 0x26c   :  { %v894_v32 = vpop.f32.mrb[3].mxu1 }
 0x26d   :  { %v799_v33 = vadd.f32 %v892_v31, %v857_v30 }
 0x26f   :  { %805 = vst.msk [vmem:[%s1321_s7] sm:$0xff] %vm804_vm0, %v799_v33 }

</bundles_post_ra>
